<compile_context>
chip_gen: v7x
topology: tpu7x:2x2x1
jax: 0.10.0
libtpu: 0.0.40
codegen_flags: <defaults>
</compile_context>

<pallas_src>
import jax
import jax.numpy as jnp
from jax.experimental import pallas as pl
from jax.experimental.pallas import tpu as pltpu


def _masked_avg_kernel(x_ref, nm_ref, inv_ref, o_ref, acc_ref):
    # x_ref  : (Bt, St, D) input tile, native dtype
    # nm_ref : (Bt, St)    f32 weights: 1.0 valid, 0.0 masked (lane-dense block)
    # inv_ref: (Bt, 1)     f32 reciprocal of the per-row valid count
    # o_ref  : (Bt, D)     f32 masked mean (written once, at the last S tile)
    # acc_ref: (Bt, D)     f32 running masked sum (VMEM scratch)
    s = pl.program_id(1)

    @pl.when(s == 0)
    def _init():
        acc_ref[...] = jnp.zeros_like(acc_ref)

    x = x_ref[...]
    # Multiply in the input dtype (0.0 / 1.0 weights are exact in bf16/f16);
    # keeps VPU work low on v6e/v7x. Upcast to f32 only for the accumulation.
    nm = nm_ref[...].astype(x.dtype)                 # (Bt, St)
    xm = x * nm[:, :, None]                          # in-kernel broadcast over D
    acc_ref[...] += jnp.sum(xm.astype(jnp.float32), axis=1)

    @pl.when(s == pl.num_programs(1) - 1)
    def _finalize():
        o_ref[...] = (acc_ref[...] * inv_ref[...]).astype(o_ref.dtype)


def _vmem_capacity_bytes(default=64 << 20):
    """Physical VMEM per TensorCore; conservative 64 MiB fallback (v7x)."""
    try:
        info = pltpu.get_tpu_info()
        cap = getattr(info, "vmem_capacity_bytes", None)
        if cap:
            return int(cap)
    except Exception:
        pass
    return default


def _pick_bt(B, target):
    """Divisor of B that is a multiple of 8 (sublane-dense (Bt, D)/(Bt, St)
    blocks), preferring a choice with B//Bt >= 2 (v7x 2-TC megacore); else B."""
    cands = [d for d in range(8, B + 1, 8) if B % d == 0]
    if not cands:
        return B
    pref = [d for d in cands if d <= target and B // d >= 2]
    if pref:
        return max(pref)
    pref = [d for d in cands if B // d >= 2]
    if pref:
        return min(pref)
    le = [d for d in cands if d <= target]
    return max(le) if le else min(cands)


def _pick_st(S, st_target):
    """Sequence tile: full S, or a multiple of 128 (lane-dense 2-D mask block).
    Returns (St, S_pad); S_pad > S means the wrapper zero-pads the tail."""
    if S <= st_target:
        return S, S
    d = (st_target // 128) * 128
    while d >= 128:
        if S % d == 0:
            return d, S
        d -= 128
    St = max(128, (st_target // 128) * 128)
    S_pad = ((S + St - 1) // St) * St
    return St, S_pad


def masked_average(x, mask, *, bt_target=8, st_max=None, block_budget_bytes=None):
    """x: (B, S, D) float (any fp dtype); mask: (B, S) bool (True = padded).
    Returns (B, 1, D) float32 masked mean over the sequence dimension."""
    B, S, D = x.shape

    # Per-generation budgets. The x block is double-buffered and the in-kernel
    # f32 intermediates cost another ~2-3x the block, so keep headroom.
    vmem_phys = _vmem_capacity_bytes()
    if block_budget_bytes is None:
        block_budget_bytes = min(12 << 20, vmem_phys // 8)   # v7x: 8 MiB, v5e/v6e: 12 MiB
    vmem_limit = int(min(vmem_phys * 3 // 4, 96 << 20))       # v7x: 48 MiB, v5e/v6e: 96 MiB

    # Lane-dense 2-D mask weights (f32 keeps tiling constraints simple; extra
    # HBM traffic is ~4 B/token, negligible vs. x). Per-row reciprocal count is
    # precomputed so the kernel never re-reduces the count per S tile.
    valid = ~mask
    nm = valid.astype(jnp.float32)                                 # (B, S)
    cnt = valid.sum(axis=1, keepdims=True).astype(jnp.float32)     # (B, 1)
    inv_cnt = 1.0 / cnt                                            # inf if row fully masked

    Bt = _pick_bt(B, bt_target)

    itemsize = jnp.dtype(x.dtype).itemsize
    st_target = max(128, block_budget_bytes // max(1, Bt * D * itemsize))
    if st_max is not None:
        st_target = max(128, min(st_target, st_max))
    St, S_pad = _pick_st(S, st_target)

    if S_pad != S:                       # zero-weight tail keeps tiles at tuned size
        pad = S_pad - S
        x = jnp.pad(x, ((0, 0), (0, pad), (0, 0)))
        nm = jnp.pad(nm, ((0, 0), (0, pad)))

    grid = (B // Bt, S_pad // St)

    cost = pl.CostEstimate(
        flops=2 * B * S_pad * D,
        transcendentals=0,
        bytes_accessed=B * S_pad * D * itemsize + B * S_pad * 4 + B * D * 4,
    )

    # TODO(synk): if profiling shows exposed DMA for short S tiles, add
    #             pipeline_mode=pl.Buffered(3) on the x BlockSpec.
    out2d = pl.pallas_call(
        _masked_avg_kernel,
        out_shape=jax.ShapeDtypeStruct((B, D), jnp.float32),
        grid=grid,
        in_specs=[
            pl.BlockSpec((Bt, St, D), lambda b, s: (b, s, 0)),
            pl.BlockSpec((Bt, St), lambda b, s: (b, s)),
            pl.BlockSpec((Bt, 1), lambda b, s: (b, 0)),
        ],
        out_specs=pl.BlockSpec((Bt, D), lambda b, s: (b, 0)),
        scratch_shapes=[pltpu.VMEM((Bt, D), jnp.float32)],
        compiler_params=pltpu.CompilerParams(
            dimension_semantics=("parallel", "arbitrary"),
            vmem_limit_bytes=vmem_limit,
        ),
        cost_estimate=cost,
    )(x, nm, inv_cnt)

    return out2d[:, None, :]   # (B, 1, D)


def _reference(x, mask):
    nm = (~mask).astype(jnp.float32)
    sumx = jnp.sum(x.astype(jnp.float32) * nm[:, :, None], axis=1, keepdims=True)
    cnt = jnp.sum(nm, axis=1, keepdims=True)[:, :, None]
    return sumx / cnt


if __name__ == "__main__":
    key = jax.random.PRNGKey(0)

    # 1) Small f32 case matching the module's forward (batch=2, seq=8, hidden=32).
    kx, km = jax.random.split(key)
    B, S, D = 2, 8, 32
    x = jax.random.normal(kx, (B, S, D), dtype=jnp.float32)
    mask = jax.random.bernoulli(km, p=0.3, shape=(B, S))
    mask = mask.at[:, 0].set(False)          # at least one valid token per row
    out = masked_average(x, mask)
    jax.block_until_ready(out)
    ref = _reference(x, mask)
    assert out.shape == (B, 1, D), out.shape
    assert jnp.allclose(out, ref, atol=1e-5, rtol=1e-5), "f32 mismatch vs reference"

    # 2) bf16 input, batch tiling Bt=8 (grid[0]=2 for the v7x 2-TC split) and a
    #    multi-tile S reduction (grid=(2, 4)) exercising the accumulator path.
    kx2, km2 = jax.random.split(jax.random.PRNGKey(1))
    B2, S2, D2 = 16, 512, 256
    x2 = jax.random.normal(kx2, (B2, S2, D2), dtype=jnp.bfloat16)
    mask2 = jax.random.bernoulli(km2, p=0.25, shape=(B2, S2))
    mask2 = mask2.at[:, 0].set(False)
    out2 = masked_average(x2, mask2, st_max=128)
    jax.block_until_ready(out2)
    ref2 = _reference(x2, mask2)
    assert out2.shape == (B2, 1, D2), out2.shape
    assert jnp.allclose(out2, ref2, atol=2e-3, rtol=2e-3), "bf16 mismatch vs reference"

    # 3) Awkward S (no 128-multiple divisor) -> zero-weight padding path.
    kx3, km3 = jax.random.split(jax.random.PRNGKey(2))
    B3, S3, D3 = 8, 320, 128
    x3 = jax.random.normal(kx3, (B3, S3, D3), dtype=jnp.float32)
    mask3 = jax.random.bernoulli(km3, p=0.5, shape=(B3, S3))
    mask3 = mask3.at[:, 0].set(False)
    out3 = masked_average(x3, mask3, st_max=128)
    jax.block_until_ready(out3)
    ref3 = _reference(x3, mask3)
    assert out3.shape == (B3, 1, D3), out3.shape
    assert jnp.allclose(out3, ref3, atol=1e-4, rtol=1e-4), "padded-S mismatch vs reference"

    print("KERNEL_OK")
</pallas_src>

<mosaic_0001>
module attributes {stable_mosaic.version = 11 : i64} {
  func.func @_masked_avg_kernel(%arg0: i32, %arg1: i32, %arg2: memref<2x8x32xf32, #tpu.memory_space<vmem>>, %arg3: memref<2x8xf32, #tpu.memory_space<vmem>>, %arg4: memref<2x1xf32, #tpu.memory_space<vmem>>, %arg5: memref<2x32xf32, #tpu.memory_space<vmem>>, %arg6: memref<2x32xf32, #tpu.memory_space<vmem>>) attributes {dimension_semantics = [#tpu.dimension_semantics<parallel>, #tpu.dimension_semantics<arbitrary>], iteration_bounds = array<i64: 1, 1>, scalar_prefetch = 0 : i64, scratch_operands = 1 : i64, tpu.core_type = #tpu.core_type<tc>, window_params = [{transform_indices = @transform_0, window_bounds = array<i64: 2, 8, 32>}, {transform_indices = @transform_1, window_bounds = array<i64: 2, 8>}, {transform_indices = @transform_2, window_bounds = array<i64: 2, 1>}, {transform_indices = @transform_3, window_bounds = array<i64: 2, 32>}]} {
    %c0_i32 = arith.constant 0 : i32
    %0 = arith.cmpi eq, %arg1, %c0_i32 : i32
    %1 = arith.extui %0 : i1 to i32
    %c0_i32_0 = arith.constant 0 : i32
    %2 = arith.cmpi ne, %1, %c0_i32_0 : i32
    scf.if %2 {
      %cst_11 = arith.constant 0.000000e+00 : f32
      %15 = vector.broadcast %cst_11 : f32 to vector<2x32xf32>
      %c0_12 = arith.constant 0 : index
      %c0_13 = arith.constant 0 : index
      %16 = vector.load %arg6[%c0_12, %c0_13] : memref<2x32xf32, #tpu.memory_space<vmem>>, vector<2x32xf32>
      tpu.vector_store %arg6[%c0_12, %c0_13], %15 {strides = array<i32>} : memref<2x32xf32, #tpu.memory_space<vmem>>, vector<2x32xf32>,
    } else {
    }
    %c0 = arith.constant 0 : index
    %c0_1 = arith.constant 0 : index
    %c0_2 = arith.constant 0 : index
    %3 = vector.load %arg2[%c0, %c0_1, %c0_2] : memref<2x8x32xf32, #tpu.memory_space<vmem>>, vector<2x8x32xf32>
    %c0_3 = arith.constant 0 : index
    %c0_4 = arith.constant 0 : index
    %4 = vector.load %arg3[%c0_3, %c0_4] : memref<2x8xf32, #tpu.memory_space<vmem>>, vector<2x8xf32>
    %5 = vector.shape_cast %4 : vector<2x8xf32> to vector<2x8x1xf32>
    %6 = vector.broadcast %5 : vector<2x8x1xf32> to vector<2x8x32xf32>
    %7 = arith.mulf %3, %6 : vector<2x8x32xf32>
    %c0_5 = arith.constant 0 : index
    %c0_6 = arith.constant 0 : index
    %8 = vector.load %arg6[%c0_5, %c0_6] : memref<2x32xf32, #tpu.memory_space<vmem>>, vector<2x32xf32>
    %cst = arith.constant dense<0.000000e+00> : vector<2x32xf32>
    %9 = vector.multi_reduction <add>, %7, %cst [1] : vector<2x8x32xf32> to vector<2x32xf32>
    %10 = arith.addf %8, %9 : vector<2x32xf32>
    %c0_7 = arith.constant 0 : index
    %c0_8 = arith.constant 0 : index
    %11 = vector.load %arg6[%c0_7, %c0_8] : memref<2x32xf32, #tpu.memory_space<vmem>>, vector<2x32xf32>
    tpu.vector_store %arg6[%c0_7, %c0_8], %10 {strides = array<i32>} : memref<2x32xf32, #tpu.memory_space<vmem>>, vector<2x32xf32>,
    %c0_i32_9 = arith.constant 0 : i32
    %12 = arith.cmpi eq, %arg1, %c0_i32_9 : i32
    %13 = arith.extui %12 : i1 to i32
    %c0_i32_10 = arith.constant 0 : i32
    %14 = arith.cmpi ne, %13, %c0_i32_10 : i32
    scf.if %14 {
      %c0_11 = arith.constant 0 : index
      %c0_12 = arith.constant 0 : index
      %15 = vector.load %arg6[%c0_11, %c0_12] : memref<2x32xf32, #tpu.memory_space<vmem>>, vector<2x32xf32>
      %c0_13 = arith.constant 0 : index
      %c0_14 = arith.constant 0 : index
      %16 = vector.load %arg4[%c0_13, %c0_14] : memref<2x1xf32, #tpu.memory_space<vmem>>, vector<2x1xf32>
      %17 = vector.broadcast %16 : vector<2x1xf32> to vector<2x32xf32>
      %18 = arith.mulf %15, %17 : vector<2x32xf32>
      %c0_15 = arith.constant 0 : index
      %c0_16 = arith.constant 0 : index
      %19 = vector.load %arg5[%c0_15, %c0_16] : memref<2x32xf32, #tpu.memory_space<vmem>>, vector<2x32xf32>
      tpu.vector_store %arg5[%c0_15, %c0_16], %18 {strides = array<i32>} : memref<2x32xf32, #tpu.memory_space<vmem>>, vector<2x32xf32>,
    } else {
    }
    return
  }
  func.func @transform_0(%arg0: i32, %arg1: i32) -> (i32, i32, i32) {
    %c0_i32 = arith.constant 0 : i32
    %c0_i32_0 = arith.constant 0 : i32
    return %arg0, %arg1, %c0_i32 : i32, i32, i32
  }
  func.func @transform_1(%arg0: i32, %arg1: i32) -> (i32, i32) {
    %c0_i32 = arith.constant 0 : i32
    return %arg0, %arg1 : i32, i32
  }
  func.func @transform_2(%arg0: i32, %arg1: i32) -> (i32, i32) {
    %c0_i32 = arith.constant 0 : i32
    %c0_i32_0 = arith.constant 0 : i32
    return %arg0, %c0_i32 : i32, i32
  }
  func.func @transform_3(%arg0: i32, %arg1: i32) -> (i32, i32) {
    %c0_i32 = arith.constant 0 : i32
    %c0_i32_0 = arith.constant 0 : i32
    return %arg0, %c0_i32 : i32, i32
  }
}

</mosaic_0001>

<bundles_post_ra>
// kernel: tpu_custom_call.1
= control target key start
LH: loop header
LB: loop body
LE: loop exit
PB: predicated region body
PF: predicated region fallthrough
CT: control target
= control target key end

     0   :  { %8 = vsyncpa [#allocation4], 0  ;;  %s220_s0 = inlined_call_operand.hbm [shape: f32[2,8,32], index: 0, kind: input, shape index: {}]   ;;  %s221_s1 = inlined_call_operand.vmem [shape: f32[2,8], index: 1, kind: input, shape index: {}]   ;;  %s222_s2 = inlined_call_operand.vmem [shape: f32[2,1], index: 2, kind: input, shape index: {}]   ;;  %s223_s3 = inlined_call_operand.hbm [shape: f32[2,32], index: 3, kind: output, shape index: {}]  }
   0x1   :  { %9 = vsyncpa [#allocation5], 0  ;;  %s161_s12 = smov [#allocation3]   ;;  %s113_s16 = scalar_lea.hbm %s220_s0, 256 }
   0x2   :  { %s15_s13 = sshll.u32 %s161_s12, 4  ;;  %p114_p0 = scmp.ne.s32.totalorder %s220_s0, %s113_s16  ;;  %s16_s13 = int_to_ptr.vmem [resolvable:$true] %s15_s13 }
   0x3   :  { %p117_p1 = scmp.lt.u32.totalorder %s113_s16, %s220_s0 }
   0x5   :  { %p119_p2 = pnand %p117_p1, %p114_p0 }
   0x7   :  { %122 = shalt.err (!%p119_p2)
}
   0x8   :  { %s123_s21 = scalar_lea.vmem %s16_s13, 256  ;;  %p128_p4 = scmp.lt.s32.totalorder %s16_s13, %s16_s13 }
   0x9   :  { %p124_p3 = scmp.ne.s32.totalorder %s16_s13, %s123_s21  ;;  %p129_p5 = scmp.lt.s32.totalorder %s123_s21, %s123_s21 }
   0xb   :  { %p130_p6 = por %p129_p5, %p128_p4 }
   0xd   :  { %p131_p7 = pnand %p130_p6, %p124_p3 }
   0xf   :  { %134 = shalt.err (!%p131_p7)
}
  0x10   :  { %s162_s22 = smov 128   ;;  %s163_s23 = smov 8  }
  0x11   :  { %21 = dma.hbm_to_vmem [thread:$0]  %s220_s0, 256, %s16_s13, [#allocation4], %s162_s22, %s162_s22, %s163_s23  }
  0x12   :  { %157 = dma.done.wait [#allocation4], 256  }
  0x13   :  { %158 = vsyncadd [#allocation4], 4294967040  ;;  %v38_v0 = vlaneseq  ;;  %v164_v1 = vmov 0   ;;  %v37_v5 = vld [vmem:[%s221_s1] sm:$0x3]  ;;  %vm33_vm0 = vcmask 254976  }
  0x14   :  { %111 = vset.pattern.permute.xlu1 %v164_v1  ;;  %112 = vset.pattern.permute.xlu0 %v164_v1  ;;  %v82_v6 = vld [vmem:[%s222_s2] sm:$0x3]  ;;  %v165_v8 = vmov 0.0   ;;  %v35_v10 = vld [vmem:[#allocation3] sm:$0xff]  ;;  %vm55_vm1 = vcmask 261120   ;;  %v36_v13 = vld [vmem:[#allocation3 + $0x8] sm:$0xff] }
  0x15   :  { %v39_v2 = vshrl.u32 %v38_v0, 7  ;;  %85 = vperm.xlu1 %111, %v82_v6   ;;  %34 = vst.msk [vmem:[#allocation2] sm:$0x3] %vm33_vm0, %v165_v8  ;;  %vm72_vm2 = vcmask 1041409   ;;  %s166_s0 = smov [#allocation6]  }
  0x16   :  { %s96_s1 = sshll.u32 %s166_s0, 4  ;;  %s97_s1 = int_to_ptr.vmem [resolvable:$true] %s96_s1 }
  0x17   :  { %v40_v3 = vsub.s32 0, %v39_v2  ;;  %v47_v4 = vsub.s32 1, %v39_v2  ;;  %s135_s2 = scalar_lea.vmem %s97_s1, 32  ;;  %p140_p9 = scmp.lt.s32.totalorder %s97_s1, %s97_s1 }
  0x18   :  { %p136_p8 = scmp.ne.s32.totalorder %s97_s1, %s135_s2  ;;  %p141_p10 = scmp.lt.s32.totalorder %s135_s2, %s135_s2 }
  0x19   :  { %v41_v7 = vrot.slane %v37_v5, %v40_v3  ;;  %v48_v9 = vrot.slane %v37_v5, %v47_v4 }
  0x1a   :  { %p142_p11 = por %p141_p10, %p140_p9 }
  0x1b   :  { %43 = vbcast.lane.b32.xlu0 %v41_v7, 256 }
  0x1c   :  { %v54_v30 = vld [vmem:[#allocation2] sm:$0x3]  ;;  %p143_p12 = pnand %p142_p11, %p136_p8 }
  0x1f   :  { %50 = vbcast.lane.b32.xlu0 %v48_v9, 256 }
  0x8d   :  { %v44_v11 = vpop.permute.xlu0 %43 }
  0x8e   :  { %v52_v12 = vmul.f32 %v44_v11, %v35_v10 }
  0x90   :  { %v56_v14 = vsel %vm55_vm1, %v52_v12, 0.0 }
  0x91   :  { %v57_v15 = vrot.slane %v56_v14, 4  ;;  %v51_v16 = vpop.permute.xlu0 %50 }
  0x92   :  { %v53_v17 = vmul.f32 %v51_v16, %v36_v13 }
  0x93   :  { %v58_v18 = vadd.f32 %v57_v15, %v56_v14 }
  0x94   :  { %v63_v19 = vsel %vm55_vm1, %v53_v17, 0.0  ;;  %v86_v33 = vpop.permute.xlu1 %85 }
  0x95   :  { %v59_v20 = vrot.slane %v58_v18, 2  ;;  %v64_v21 = vrot.slane %v63_v19, 4 }
  0x97   :  { %v60_v22 = vadd.f32 %v59_v20, %v58_v18  ;;  %v65_v23 = vadd.f32 %v64_v21, %v63_v19 }
  0x99   :  { %v66_v24 = vrot.slane %v65_v23, 2  ;;  %v61_v25 = vrot.slane %v60_v22, 1 }
  0x9b   :  { %v67_v26 = vadd.f32 %v66_v24, %v65_v23  ;;  %v62_v28 = vadd.f32 %v61_v25, %v60_v22 }
  0x9d   :  { %v68_v27 = vrot.slane %v67_v26, 1 }
  0x9f   :  { %v69_v29 = vadd.f32 %v68_v27, %v67_v26 }
  0xa1   :  { %v73_v31 = vsel %vm72_vm2, %v69_v29, %v62_v28 }
  0xa2   :  { %v75_v32 = vadd.f32 %v73_v31, %v54_v30 }
  0xa4   :  { %77 = vst.msk [vmem:[#allocation2] sm:$0x3] %vm33_vm0, %v75_v32 }
  0xab   :  { %v81_v34 = vld [vmem:[#allocation2] sm:$0x3] }
  0xac   :  { %v88_v35 = vmul.f32 %v86_v33, %v81_v34 }
  0xae   :  { %89 = vst.msk [vmem:[#allocation6] sm:$0x3] %vm33_vm0, %v88_v35 }
  0xaf   :  { %146 = shalt.err (!%p143_p12)
}
  0xb0   :  { %s147_s5 = scalar_lea.hbm %s223_s3, 32 }
  0xb1   :  { %p148_p13 = scmp.ne.s32.totalorder %s223_s3, %s147_s5  ;;  %p151_p0 = scmp.lt.u32.totalorder %s147_s5, %s223_s3 }
  0xb3   :  { %p153_p1 = pnand %p151_p0, %p148_p13 }
  0xb5   :  { %156 = shalt.err (!%p153_p1)
}
  0xb6   :  { %99 = dma.vmem_to_hbm [thread:$0]  %s97_s1, 32, %s223_s3, [#allocation5]  }
  0xb7   :  { %159 = dma.done.wait [#allocation5], 32  }
  0xb8   :  { %160 = vsyncadd [#allocation5], 4294967264 }
  0xb9   :  { %103 = vsyncpa [#allocation4], 1 }
  0xba   :  { %104 = vsyncpa [#allocation5], 1 }

</bundles_post_ra>
